<compile_context>
chip_gen: v6e
topology: v6e:2x2x1
jax: 0.10.0
libtpu: 0.0.40
codegen_flags: <defaults>
</compile_context>

<pallas_src>
import functools

import jax
import jax.numpy as jnp
from jax.experimental import pallas as pl
from jax.experimental.pallas import tpu as pltpu

NEG = -1e30  # "minus infinity" that stays NaN-free through max/exp/log


@functools.lru_cache(maxsize=None)
def _roll_shift_sign():
    """Probe pltpu.roll's shift convention once (eager, outside jit).

    Returns +1 if pltpu.roll follows the np.roll convention
    (result[i] = x[i - shift]); -1 otherwise.  The CTC recursion needs
    alpha[s-1] / alpha[s-2], so the kernel multiplies its static shifts by this
    sign.  One tiny (8, 128) kernel, compiled once per process.
    """
    def k(x_ref, o_ref):
        o_ref[...] = pltpu.roll(x_ref[...], 1, 1)

    x = jax.lax.broadcasted_iota(jnp.float32, (8, 128), 1)
    y = pl.pallas_call(k, out_shape=jax.ShapeDtypeStruct((8, 128), jnp.float32))(x)
    return 1 if float(y[0, 1]) == 0.0 else -1


def _ctc_kernel(in_len_sref,            # SMEM scalar prefetch: (B_pad,) i32
                lp_ref,                 # (B_TILE, T, C)    float  raw scores
                ext_ref,                # (B_TILE, 1, SPAD) i32    extended labels (-1 = lane pad)
                skip_ref,               # (B_TILE, SPAD)    f32    1.0 where the s-2 skip is allowed
                ilen_ref,               # (B_TILE, 1)       i32
                tlen_ref,               # (B_TILE, 1)       i32
                loss_ref,               # (B_TILE, 1)       f32    out: per-sample CTC loss
                plen_ref,               # (B_TILE, 1)       i32    out: greedy decode length
                lpext_ref,              # VMEM scratch (B_TILE*TPAD, SPAD) f32 (sample-major rows)
                *, T, C, SPAD, TPAD, B_TILE, U, N_CHUNKS, RS):
    x = lp_ref[...].astype(jnp.float32)                               # (B_TILE, T, C)

    # ---- log-softmax normalizer only (no full (T, C) log_softmax materialized) ----
    mx_c = jnp.max(x, axis=-1, keepdims=True)                         # (B_TILE, T, 1)
    lse = mx_c + jnp.log(jnp.sum(jnp.exp(x - mx_c), axis=-1, keepdims=True))

    # ---- greedy decode length --------------------------------------------------
    # Matches the module's ctc_decode(): argmax over the FULL padded T (the reference
    # never passes input_lengths there), collapse repeats, drop blanks (labels >= 1).
    # TODO(synk): MyDataset.ctc_arr2txt space-dedup / strip() rules are vocab-specific and omitted.
    c_iota = jax.lax.broadcasted_iota(jnp.int32, (B_TILE, T, C), 2)
    y = jnp.min(jnp.where(x == mx_c, c_iota, C), axis=-1)             # (B_TILE, T) first argmax
    plen = jnp.sum((y[:, :1] >= 1).astype(jnp.int32), axis=1, keepdims=True)
    if T > 1:
        rest = jnp.logical_and(y[:, 1:] != y[:, :-1], y[:, 1:] >= 1)
        plen = plen + jnp.sum(rest.astype(jnp.int32), axis=1, keepdims=True)
    plen_ref[...] = plen

    # ---- per-extended-state emission log-probs via one-hot MXU matmul -----------
    ext = ext_ref[...]                                                # (B_TILE, 1, SPAD)
    cls = jax.lax.broadcasted_iota(jnp.int32, (1, C, 1), 1)
    e_mat = (cls == ext).astype(jnp.float32)                          # (B_TILE, C, SPAD)
    lpx = jax.lax.dot_general(x, e_mat, (((2,), (1,)), ((0,), (0,))),
                              preferred_element_type=jnp.float32)     # (B_TILE, T, SPAD)
    lpx = lpx - lse                                                   # log_softmax at each state
    for i in range(B_TILE):                                           # contiguous, aligned stores
        lpext_ref[pl.ds(i * TPAD, T), :] = lpx[i]

    # ---- CTC forward (alpha) recursion ------------------------------------------
    lane = jax.lax.broadcasted_iota(jnp.int32, (B_TILE, SPAD), 1)
    in_len = ilen_ref[...]                                            # (B_TILE, 1)
    # loop-invariant additive masks (hoisted): kill wrapped lanes / illegal skips
    emask1 = jnp.where(lane >= 1, 0.0, NEG).astype(jnp.float32)
    emask2 = jnp.where(skip_ref[...] > 0.5, 0.0, NEG).astype(jnp.float32)

    lp0 = lpext_ref[pl.ds(0, B_TILE, stride=TPAD), :]                 # (B_TILE, SPAD) slab at t=0
    alpha0 = jnp.where(lane <= 1, lp0, NEG)
    alpha0 = jnp.where(in_len >= 1, alpha0, NEG)                      # in_len == 0 -> impossible path

    # dynamic trip count: only iterate up to the longest input in this block
    base = pl.program_id(0) * B_TILE
    max_len = in_len_sref[base]
    for i in range(1, B_TILE):
        max_len = jnp.maximum(max_len, in_len_sref[base + i])
    n_chunks = jnp.minimum((jnp.maximum(max_len, 1) - 1 + (U - 1)) // U, N_CHUNKS)

    def chunk(ci, alpha):
        t0 = 1 + ci * U
        for dt in range(U):                                           # statically unrolled body
            t = t0 + dt
            tt = jnp.minimum(t, T - 1)                                # overhang steps stay frozen
            lpe = lpext_ref[pl.ds(tt, B_TILE, stride=TPAD), :]        # (B_TILE, SPAD)
            a1 = pltpu.roll(alpha, RS * 1, 1) + emask1                # alpha[s-1]
            a2 = pltpu.roll(alpha, RS * 2, 1) + emask2                # alpha[s-2] where allowed
            m = jnp.maximum(jnp.maximum(alpha, a1), a2)
            new = m + jnp.log(jnp.exp(alpha - m) + jnp.exp(a1 - m)
                              + jnp.exp(a2 - m)) + lpe
            alpha = jnp.where(in_len > t, new, alpha)                 # freeze at each sample's length
        return alpha

    alpha = jax.lax.fori_loop(0, n_chunks, chunk, alpha0)

    # ---- readout: -logsumexp(alpha[2L-1], alpha[2L]) -----------------------------
    end = 2 * tlen_ref[...]                                           # (B_TILE, 1)
    pick = jnp.logical_or(lane == end, lane == end - 1)
    vals = jnp.where(pick, alpha, NEG)
    m = jnp.max(vals, axis=1, keepdims=True)
    loss_ref[...] = -(m + jnp.log(jnp.sum(jnp.exp(vals - m), axis=1, keepdims=True)))


def ctc_loss_with_length_penalty(log_probs, targets, input_lengths, target_lengths,
                                 blank=0, length_penalty_factor=1.0):
    """Forward pass of CTCLossWithLengthPenalty; log_probs is (B, T, C) batch-major."""
    B, T, C = log_probs.shape
    S = targets.shape[1]
    SEXT = 2 * S + 1
    SPAD = ((SEXT + 127) // 128) * 128       # lane-pad extended states (full-lane vst / MXU tiles)
    TPAD = ((T + 7) // 8) * 8                # sublane-align each sample's emission slab

    # Batch tile: fills vreg sublanes in the recursion and amortizes per-grid-step
    # overhead.  Either one block covers the whole (small) batch, or blocks of 8.
    if B <= 8:
        B_TILE, B_pad = B, B
    else:
        B_TILE, B_pad = 8, ((B + 7) // 8) * 8

    in_len = jnp.clip(input_lengths.astype(jnp.int32), 0, T)
    tgt_len = jnp.clip(target_lengths.astype(jnp.int32), 0, S)
    tgt = targets.astype(jnp.int32)
    # keep bf16 inputs as bf16 on the wire; cast to f32 inside the kernel
    lp = log_probs if log_probs.dtype in (jnp.bfloat16, jnp.float32) \
        else log_probs.astype(jnp.float32)

    # ---- tiny data-dependent tables, precomputed in plain JAX -------------------
    s = jnp.arange(SPAD)
    odd = (s % 2 == 1) & (s < SEXT)
    j1 = jnp.clip((s - 1) // 2, 0, max(S - 1, 0))
    j2 = jnp.clip((s - 3) // 2, 0, max(S - 1, 0))
    lbl1 = tgt[:, j1]                                                 # (B, SPAD)
    lbl2 = tgt[:, j2]
    ext = jnp.where(odd[None, :], lbl1,
                    jnp.where((s < SEXT)[None, :], jnp.int32(blank), jnp.int32(-1)))
    allow_skip = ((odd & (s >= 3))[None, :] & (lbl1 != lbl2)).astype(jnp.float32)

    if B_pad > B:
        pad = B_pad - B
        lp = jnp.pad(lp, ((0, pad), (0, 0), (0, 0)))
        ext = jnp.pad(ext, ((0, pad), (0, 0)), constant_values=-1)
        allow_skip = jnp.pad(allow_skip, ((0, pad), (0, 0)))
        in_len = jnp.pad(in_len, (0, pad))
        tgt_len = jnp.pad(tgt_len, (0, pad))

    U = max(1, min(8, T - 1))
    n_chunks_total = (T - 1 + U - 1) // U if T > 1 else 0

    kernel = functools.partial(
        _ctc_kernel, T=T, C=C, SPAD=SPAD, TPAD=TPAD, B_TILE=B_TILE, U=U,
        N_CHUNKS=n_chunks_total, RS=_roll_shift_sign())

    # VMEM budget: double-buffered input block + scratch + the big in-kernel
    # intermediates (e_mat / lpx), with headroom.  (v7x has only 64 MiB physical
    # VMEM: very large T*C would need a smaller B_TILE / a C sub-tiling pass.)
    in_block = B_TILE * T * C * lp.dtype.itemsize
    big_tmp = (B_TILE * C * SPAD * 4 + B_TILE * T * SPAD * 4
               + B_TILE * TPAD * SPAD * 4)
    vmem_limit = int(min(max(2 * in_block + big_tmp + (8 << 20), 32 << 20), 110 << 20))

    loss_b, plen_b = pl.pallas_call(
        kernel,
        out_shape=(jax.ShapeDtypeStruct((B_pad, 1), jnp.float32),
                   jax.ShapeDtypeStruct((B_pad, 1), jnp.int32)),
        grid_spec=pltpu.PrefetchScalarGridSpec(
            num_scalar_prefetch=1,
            grid=(B_pad // B_TILE,),
            in_specs=[
                pl.BlockSpec((B_TILE, T, C), lambda g, il: (g, 0, 0)),
                pl.BlockSpec((B_TILE, 1, SPAD), lambda g, il: (g, 0, 0)),
                pl.BlockSpec((B_TILE, SPAD), lambda g, il: (g, 0)),
                pl.BlockSpec((B_TILE, 1), lambda g, il: (g, 0)),
                pl.BlockSpec((B_TILE, 1), lambda g, il: (g, 0)),
            ],
            out_specs=(
                pl.BlockSpec((B_TILE, 1), lambda g, il: (g, 0)),
                pl.BlockSpec((B_TILE, 1), lambda g, il: (g, 0)),
            ),
            scratch_shapes=[pltpu.VMEM((B_TILE * TPAD, SPAD), jnp.float32)],
        ),
        compiler_params=pltpu.CompilerParams(
            dimension_semantics=("parallel",),     # independent batch blocks (2 TCs on v7x)
            vmem_limit_bytes=vmem_limit,
        ),
    )(in_len, lp, ext.reshape(B_pad, 1, SPAD), allow_skip,
      in_len.reshape(B_pad, 1), tgt_len.reshape(B_pad, 1))

    per_loss = loss_b[:B, 0]
    pred_len = plen_b[:B, 0].astype(jnp.float32)
    tl_f = target_lengths.astype(jnp.float32)

    # nn.CTCLoss(blank, zero_infinity=True, reduction='mean') semantics:
    per_loss = jnp.where(jnp.logical_or(~jnp.isfinite(per_loss), per_loss >= 1e29),
                         0.0, per_loss)
    ctc = jnp.mean(per_loss / jnp.maximum(tl_f, 1.0))

    # Matches the reference module exactly, including the double application of
    # length_penalty_factor (once inside length_penalty, once as the mixing weight).
    length_penalty = jnp.abs(pred_len - tl_f) * length_penalty_factor
    return (length_penalty_factor * ctc
            + (1.0 - length_penalty_factor) * jnp.mean(length_penalty))


def _reference_total_loss(log_probs, targets, input_lengths, target_lengths,
                          blank, factor):
    """Pure-JAX reference mirroring the PyTorch module's forward (for validation)."""
    B, T, C = log_probs.shape
    S = targets.shape[1]
    lp = jax.nn.log_softmax(log_probs.astype(jnp.float32), axis=-1)
    SEXT = 2 * S + 1
    s = jnp.arange(SEXT)
    odd = (s % 2) == 1
    j1 = jnp.clip((s - 1) // 2, 0, S - 1)
    j2 = jnp.clip((s - 3) // 2, 0, S - 1)
    tgt = targets.astype(jnp.int32)
    ext = jnp.where(odd[None, :], tgt[:, j1], jnp.int32(blank))       # (B, SEXT)
    allow_skip = (odd & (s >= 3))[None, :] & (tgt[:, j1] != tgt[:, j2])
    idx = jnp.broadcast_to(ext[:, None, :], (B, T, SEXT))
    lpe = jnp.take_along_axis(lp, idx, axis=2)                        # (B, T, SEXT)
    il = jnp.clip(input_lengths.astype(jnp.int32), 0, T)
    tl = jnp.clip(target_lengths.astype(jnp.int32), 0, S)
    alpha = jnp.where(s[None, :] <= 1, lpe[:, 0, :], NEG)
    alpha = jnp.where((il >= 1)[:, None], alpha, NEG)

    def step(alpha, t):
        a1 = jnp.concatenate([jnp.full((B, 1), NEG), alpha[:, :-1]], axis=1)
        a2 = jnp.concatenate([jnp.full((B, 2), NEG), alpha[:, :-2]], axis=1)
        a2 = jnp.where(allow_skip, a2, NEG)
        m = jnp.maximum(jnp.maximum(alpha, a1), a2)
        new = m + jnp.log(jnp.exp(alpha - m) + jnp.exp(a1 - m) + jnp.exp(a2 - m)) \
            + lpe[:, t, :]
        return jnp.where((il > t)[:, None], new, alpha), None

    alpha, _ = jax.lax.scan(step, alpha, jnp.arange(1, T))
    end = 2 * tl[:, None]
    vals = jnp.where((s[None, :] == end) | (s[None, :] == end - 1), alpha, NEG)
    m = jnp.max(vals, axis=1)
    per = -(m + jnp.log(jnp.sum(jnp.exp(vals - m[:, None]), axis=1)))
    per = jnp.where(jnp.logical_or(~jnp.isfinite(per), per >= 1e29), 0.0, per)
    ctc = jnp.mean(per / jnp.maximum(tl.astype(jnp.float32), 1.0))
    y = jnp.argmax(log_probs, axis=-1)
    prev = jnp.concatenate([jnp.full((B, 1), -1, y.dtype), y[:, :-1]], axis=1)
    plen = jnp.sum((y != prev) & (y >= 1), axis=1).astype(jnp.float32)
    pen = jnp.abs(plen - tl.astype(jnp.float32)) * factor
    return factor * ctc + (1.0 - factor) * jnp.mean(pen)


if __name__ == "__main__":
    key = jax.random.PRNGKey(0)
    B, T, C, S = 2, 16, 32, 8
    k1, k2 = jax.random.split(key)
    log_probs = jax.random.normal(k1, (B, T, C), dtype=jnp.float32)
    targets = jax.random.randint(k2, (B, S), 1, C)          # labels in [1, C-1] (no blank)
    input_lengths = jnp.array([T, T - 3], dtype=jnp.int32)
    target_lengths = jnp.array([S, S - 2], dtype=jnp.int32)

    total = ctc_loss_with_length_penalty(
        log_probs, targets, input_lengths, target_lengths,
        blank=0, length_penalty_factor=0.7)
    total = jax.block_until_ready(total)

    ref = _reference_total_loss(log_probs, targets, input_lengths, target_lengths,
                                0, 0.7)
    ref = jax.block_until_ready(ref)

    assert jnp.isfinite(total), "loss is not finite"
    assert abs(float(total) - float(ref)) <= 0.1 + 0.02 * abs(float(ref)), \
        f"kernel/reference mismatch: {float(total)} vs {float(ref)}"
    print("KERNEL_OK")
</pallas_src>

<mosaic_0001>
module attributes {stable_mosaic.version = 11 : i64} {
  func.func @k(%arg0: memref<8x128xf32, #tpu.memory_space<vmem>>, %arg1: memref<8x128xf32, #tpu.memory_space<vmem>>) attributes {dimension_semantics = [], scalar_prefetch = 0 : i64, scratch_operands = 0 : i64, tpu.core_type = #tpu.core_type<tc>} {
    %c0 = arith.constant 0 : index
    %c0_0 = arith.constant 0 : index
    %0 = vector.load %arg0[%c0, %c0_0] : memref<8x128xf32, #tpu.memory_space<vmem>>, vector<8x128xf32>
    %c1_i32 = arith.constant 1 : i32
    %1 = tpu.dynamic_rotate %0 by %c1_i32 dim 1 : vector<8x128xf32>, i32 -> vector<8x128xf32>
    %c0_1 = arith.constant 0 : index
    %c0_2 = arith.constant 0 : index
    %2 = vector.load %arg1[%c0_1, %c0_2] : memref<8x128xf32, #tpu.memory_space<vmem>>, vector<8x128xf32>
    tpu.vector_store %arg1[%c0_1, %c0_2], %1 {strides = array<i32>} : memref<8x128xf32, #tpu.memory_space<vmem>>, vector<8x128xf32>,
    return
  }
}

</mosaic_0001>

<bundles_post_ra>
// kernel: tpu_custom_call.1
= control target key start
LH: loop header
LB: loop body
LE: loop exit
PB: predicated region body
PF: predicated region fallthrough
CT: control target
= control target key end

     0   :  { %6 = vsyncpa [#allocation3], 0  ;;  %s106_s0 = inlined_call_operand.hbm [shape: f32[8,128], index: 0, kind: input, shape index: {}]   ;;  %s107_s1 = inlined_call_operand.hbm [shape: f32[8,128], index: 1, kind: output, shape index: {}]  }
   0x1   :  { %7 = vsyncpa [#allocation4], 0  ;;  %s87_s6 = smov [#allocation2]  }
   0x2   :  { %s14_s7 = sshll.u32 %s87_s6, 4  ;;  %s15_s7 = int_to_ptr.vmem [resolvable:$true] %s14_s7 }
   0x3   :  { %s51_s8 = scalar_lea.vmem %s15_s7, 128  ;;  %p56_p1 = scmp.lt.s32.totalorder %s15_s7, %s15_s7 }
   0x4   :  { %p52_p0 = scmp.ne.s32.totalorder %s15_s7, %s51_s8  ;;  %p57_p2 = scmp.lt.s32.totalorder %s51_s8, %s51_s8 }
   0x6   :  { %p58_p3 = por %p57_p2, %p56_p1 }
   0x8   :  { %p59_p4 = pnand %p58_p3, %p52_p0 }
   0xa   :  { %62 = shalt.err (!%p59_p4)
}
   0xb   :  { %17 = dma.hbm_to_vmem [thread:$0]  %s106_s0, 128, %s15_s7, [#allocation3]  }
   0xc   :  { %83 = dma.done.wait [#allocation3], 128  }
   0xd   :  { %84 = vsyncadd [#allocation3], 4294967168  ;;  %v21_v0 = vld [vmem:[#allocation2] sm:$0xff]  ;;  %s88_s11 = smov 1   ;;  %s89_s12 = smov [#allocation5]  }
   0xe   :  { %22 = vrot.lane.b32.xlu0 %v21_v0, %s88_s11  ;;  %s31_s13 = sshll.u32 %s89_s12, 4  ;;  %s32_s13 = int_to_ptr.vmem [resolvable:$true] %s31_s13 }
   0xf   :  { %s63_s14 = scalar_lea.vmem %s32_s13, 128  ;;  %p68_p6 = scmp.lt.s32.totalorder %s32_s13, %s32_s13 }
  0x10   :  { %p64_p5 = scmp.ne.s32.totalorder %s32_s13, %s63_s14  ;;  %p69_p7 = scmp.lt.s32.totalorder %s63_s14, %s63_s14 }
  0x12   :  { %p70_p8 = por %p69_p7, %p68_p6 }
  0x14   :  { %p71_p9 = pnand %p70_p8, %p64_p5 }
  0x80   :  { %v23_v1 = vpop.permute.xlu0 %22 }
  0x81   :  { %24 = vst [vmem:[#allocation5] sm:$0xff] %v23_v1 }
  0x82   :  { %74 = shalt.err (!%p71_p9)
}
  0x83   :  { %34 = dma.vmem_to_hbm [thread:$0]  %s32_s13, 128, %s107_s1, [#allocation4]  }
  0x84   :  { %85 = dma.done.wait [#allocation4], 128  }
  0x85   :  { %86 = vsyncadd [#allocation4], 4294967168 }
  0x86   :  { %38 = vsyncpa [#allocation3], 1 }
  0x87   :  { %39 = vsyncpa [#allocation4], 1 }

</bundles_post_ra>
